<compile_context>
chip_gen: v6e
topology: v6e:2x2x1
jax: 0.10.0
libtpu: 0.0.40
codegen_flags: <defaults>
</compile_context>

<pallas_src>
import functools

import numpy as np
import jax
import jax.numpy as jnp
from jax import lax
from jax.experimental import pallas as pl
from jax.experimental.pallas import tpu as pltpu

_LANES = 128
_MAX_SUB = 512          # max sublanes (rows of 128 samples) per grid step / split
_CHUNK_ROWS = 32        # in-kernel strip-mine granularity (multiple of 8)
_N_SPLIT = 2            # leading "parallel" grid axis (keeps both v7x TCs busy)


def _next_pow2(x):
    x = max(int(x), 1)
    return 1 << (x - 1).bit_length()


def _bucket(x):
    """Round up to the nearest value in {1,2,3,4,6,8,12,16,...} (<=33% waste)."""
    x = max(int(x), 1)
    if x <= 2:
        return x
    p = 1 << (x - 1).bit_length()          # next pow2 >= x
    if p % 4 == 0 and 3 * p // 4 >= x:
        return 3 * p // 4
    return p


def _ce_acc_kernel(logits_ref, labels_ref, out_ref, *,
                   ignore_index, num_classes, chunk_rows):
    """One (SUB, 128)-sample tile: masked CE + top-1 correctness partial sums.

    logits_ref : (C, SUB, 128) f32   class-major, samples lane/sublane-dense
    labels_ref : (SUB, 128)    i32
    out_ref    : (1, 3, 8, 128) f32  tiny resident accumulator [loss, valid, correct]
    """
    t = pl.program_id(1)

    @pl.when(t == 0)
    def _init():
        out_ref[...] = jnp.zeros_like(out_ref)

    sub = labels_ref.shape[0]
    n_chunks = sub // chunk_rows

    def chunk_body(i, carry):
        loss_acc, valid_acc, corr_acc = carry
        off = pl.multiple_of(i * chunk_rows, chunk_rows)

        labels = labels_ref[pl.ds(off, chunk_rows), :]                  # (chunk, 128)
        valid = (labels != ignore_index).astype(jnp.float32)

        # Class-axis max: C-1 dense elementwise maxes (C is tiny & static).
        row_max = logits_ref[0, pl.ds(off, chunk_rows), :]
        for c in range(1, num_classes):
            row_max = jnp.maximum(row_max, logits_ref[c, pl.ds(off, chunk_rows), :])

        # Fused pass over classes: sum-exp, target logit, first-max correctness.
        sum_exp = jnp.zeros_like(row_max)
        tgt = jnp.zeros_like(row_max)
        correct = jnp.zeros(labels.shape, dtype=jnp.bool_)
        seen_max = jnp.zeros(labels.shape, dtype=jnp.bool_)   # first-max tie-break
        for c in range(num_classes):
            lc = logits_ref[c, pl.ds(off, chunk_rows), :]
            sum_exp = sum_exp + jnp.exp(lc - row_max)
            is_lbl = labels == c
            tgt = jnp.where(is_lbl, lc, tgt)
            is_max = lc == row_max
            correct = correct | (is_lbl & is_max & jnp.logical_not(seen_max))
            seen_max = seen_max | is_max

        loss = (row_max + jnp.log(sum_exp) - tgt) * valid
        corr = valid * correct.astype(jnp.float32)

        # Fold the chunk's sublanes down to a single (8, 128) vreg per stat.
        fold = lambda x: jnp.sum(x.reshape(-1, 8, _LANES), axis=0)
        return (loss_acc + fold(loss),
                valid_acc + fold(valid),
                corr_acc + fold(corr))

    init = (jnp.zeros((8, _LANES), jnp.float32),
            jnp.zeros((8, _LANES), jnp.float32),
            jnp.zeros((8, _LANES), jnp.float32))
    loss_acc, valid_acc, corr_acc = lax.fori_loop(
        0, n_chunks, chunk_body, init, unroll=(n_chunks <= 2))

    out_ref[0, 0] += loss_acc
    out_ref[0, 1] += valid_acc
    out_ref[0, 2] += corr_acc


@functools.partial(jax.jit, static_argnames=("ignore_index",))
def _ce_and_acc(logits, labels, *, ignore_index):
    """Mean CE over non-ignored labels + top-1 accuracy * 100 (single Pallas call)."""
    logits = jnp.asarray(logits, jnp.float32)
    labels = jnp.asarray(labels, jnp.int32).reshape(-1)
    n, num_classes = logits.shape

    # --- tiling: rows of 128 lane-packed samples, split 2 ways, bucketed ---
    rows = -(-n // _LANES)                         # cdiv(n, 128)
    rows_per_split = -(-rows // _N_SPLIT)
    if rows_per_split <= _MAX_SUB:
        sub = max(8, _next_pow2(rows_per_split))   # one step per split
        t_steps = 1
    else:
        sub = _MAX_SUB
        t_steps = _bucket(-(-rows_per_split // _MAX_SUB))
    r_pad = _N_SPLIT * sub * t_steps
    n_pad = r_pad * _LANES
    chunk_rows = min(_CHUNK_ROWS, sub)

    # Single layout pass (fused under jit): class-major, samples lane-dense,
    # padded rows carry ignore_index so the kernel masks them.
    logits_t = jnp.pad(logits.T, ((0, 0), (0, n_pad - n))).reshape(
        num_classes, r_pad, _LANES)
    labels_t = jnp.pad(labels, (0, n_pad - n),
                       constant_values=ignore_index).reshape(r_pad, _LANES)

    kernel = functools.partial(
        _ce_acc_kernel,
        ignore_index=int(ignore_index),
        num_classes=int(num_classes),
        chunk_rows=int(chunk_rows),
    )

    stats = pl.pallas_call(
        kernel,
        out_shape=jax.ShapeDtypeStruct((_N_SPLIT, 3, 8, _LANES), jnp.float32),
        grid_spec=pltpu.PrefetchScalarGridSpec(
            num_scalar_prefetch=0,
            grid=(_N_SPLIT, t_steps),
            in_specs=[
                pl.BlockSpec((num_classes, sub, _LANES),
                             lambda s, t: (0, s * t_steps + t, 0)),
                pl.BlockSpec((sub, _LANES),
                             lambda s, t: (s * t_steps + t, 0)),
            ],
            out_specs=pl.BlockSpec((1, 3, 8, _LANES),
                                   lambda s, t: (s, 0, 0, 0)),
        ),
        compiler_params=pltpu.CompilerParams(
            dimension_semantics=("parallel", "arbitrary")),
    )(logits_t, labels_t)

    # Tiny (2,3,8,128) -> (3,) reduction; negligible outside the kernel.
    totals = jnp.sum(stats, axis=(0, 2, 3))
    loss_sum, cnt, correct = totals[0], totals[1], totals[2]
    denom = jnp.maximum(cnt, 1.0)
    loss = jnp.where(cnt > 0, loss_sum / denom, 0.0)
    acc = jnp.where(cnt > 0, 100.0 * correct / denom, 0.0)
    return loss, acc


def ce_and_acc(logits, labels, ignore_index):
    return _ce_and_acc(logits, labels, ignore_index=int(ignore_index))


class SDMGRLossJAX:
    """JAX/Pallas port of toddleocr SDMGRLoss (forward pass)."""

    def __init__(self, node_weight=1.0, edge_weight=1.0, ignore=0):
        self.node_weight = node_weight
        self.edge_weight = edge_weight
        self.ignore = ignore

    def pre_process(self, gts, tag):
        # TODO(synk): pure Python / numpy variable-length slicing (as in the
        # original torch code); no Pallas equivalent, stays on host.
        gts = np.asarray(gts)
        tag = np.asarray(tag).tolist()
        temp_gts = []
        for i in range(len(tag)):
            num = int(tag[i][0])
            temp_gts.append(np.asarray(gts[i, :num, :num + 1], dtype=np.int64))
        return temp_gts

    def forward(self, pred, batch):
        node_preds, edge_preds = pred
        gts, tag = batch[4], batch[5]
        gts = self.pre_process(gts, tag)
        node_gts = np.concatenate([g[:, 0] for g in gts])
        edge_gts = np.concatenate([g[:, 1:].reshape(-1) for g in gts])

        # TODO(synk): node & edge CE could be fused into one pallas_call by
        # padding classes + remapping ignore labels; kept separate for clarity.
        loss_node, acc_node = ce_and_acc(node_preds, node_gts, self.ignore)
        loss_edge, acc_edge = ce_and_acc(edge_preds, edge_gts, -1)
        loss = self.node_weight * loss_node + self.edge_weight * loss_edge
        return dict(loss=loss, loss_node=loss_node, loss_edge=loss_edge,
                    acc_node=acc_node, acc_edge=acc_edge)


def _ref_ce_acc(logits, labels, ignore):
    """Plain-numpy reference (matches torch CrossEntropyLoss + accuracy)."""
    logits = np.asarray(logits, np.float32)
    labels = np.asarray(labels, np.int64)
    valid = labels != ignore
    m = logits.max(-1, keepdims=True)
    lse = m[:, 0] + np.log(np.exp(logits - m).sum(-1))
    safe = np.clip(labels, 0, logits.shape[1] - 1)
    tgt = logits[np.arange(len(labels)), safe]
    loss = float((lse - tgt)[valid].mean()) if valid.any() else 0.0
    pred_lbl = logits.argmax(-1)
    acc = (100.0 * float((pred_lbl[valid] == labels[valid]).mean())
           if valid.any() else 0.0)
    return loss, acc


if __name__ == "__main__":
    key = jax.random.PRNGKey(0)

    # Small synthetic SDMGR batch: 2 samples, 5 and 7 text nodes.
    B = 2
    nums = [5, 7]
    max_num = 8
    node_classes = 4   # node class 0 == ignore index
    edge_classes = 2

    total_nodes = sum(nums)                  # 12
    total_edges = sum(n * n for n in nums)   # 74

    k1, k2, k3, k4 = jax.random.split(key, 4)
    node_preds = jax.random.normal(k1, (total_nodes, node_classes), jnp.float32)
    edge_preds = jax.random.normal(k2, (total_edges, edge_classes), jnp.float32)

    node_lbl = np.asarray(
        jax.random.randint(k3, (B, max_num), 0, node_classes), np.int64)
    edge_lbl = np.asarray(
        jax.random.randint(k4, (B, max_num, max_num), -1, edge_classes), np.int64)

    gts = np.zeros((B, max_num, max_num + 1), dtype=np.int64)
    for i, n in enumerate(nums):
        gts[i, :n, 0] = node_lbl[i, :n]
        gts[i, :n, 1:n + 1] = edge_lbl[i, :n, :n]
    tag = np.array([[nums[0], 0], [nums[1], 0]], dtype=np.int64)

    batch = [None, None, None, None, gts, tag]

    loss_mod = SDMGRLossJAX(node_weight=1.0, edge_weight=1.0, ignore=0)
    out = loss_mod.forward((node_preds, edge_preds), batch)
    out = jax.tree_util.tree_map(jax.block_until_ready, out)

    # Verify against plain-numpy reference.
    node_gts_ref = np.concatenate([gts[i, :n, 0] for i, n in enumerate(nums)])
    edge_gts_ref = np.concatenate(
        [gts[i, :n, 1:n + 1].reshape(-1) for i, n in enumerate(nums)])
    ln_ref, an_ref = _ref_ce_acc(np.asarray(node_preds), node_gts_ref, 0)
    le_ref, ae_ref = _ref_ce_acc(np.asarray(edge_preds), edge_gts_ref, -1)

    np.testing.assert_allclose(float(out["loss_node"]), ln_ref, rtol=1e-5, atol=1e-5)
    np.testing.assert_allclose(float(out["loss_edge"]), le_ref, rtol=1e-5, atol=1e-5)
    np.testing.assert_allclose(float(out["loss"]), ln_ref + le_ref, rtol=1e-5, atol=1e-5)
    np.testing.assert_allclose(float(out["acc_node"]), an_ref, rtol=1e-5, atol=1e-4)
    np.testing.assert_allclose(float(out["acc_edge"]), ae_ref, rtol=1e-5, atol=1e-4)

    print("KERNEL_OK")
</pallas_src>

<mosaic_0001>
module attributes {stable_mosaic.version = 11 : i64} {
  func.func @_ce_acc_kernel(%arg0: i32, %arg1: i32, %arg2: memref<4x8x128xf32, #tpu.memory_space<vmem>>, %arg3: memref<8x128xi32, #tpu.memory_space<vmem>>, %arg4: memref<1x3x8x128xf32, #tpu.memory_space<vmem>>) attributes {dimension_semantics = [#tpu.dimension_semantics<parallel>, #tpu.dimension_semantics<arbitrary>], iteration_bounds = array<i64: 2, 1>, scalar_prefetch = 0 : i64, scratch_operands = 0 : i64, tpu.core_type = #tpu.core_type<tc>, window_params = [{transform_indices = @transform_0, window_bounds = array<i64: 4, 8, 128>}, {transform_indices = @transform_1, window_bounds = array<i64: 8, 128>}, {transform_indices = @transform_2, window_bounds = array<i64: 1, 3, 8, 128>}]} {
    %c0_i32 = arith.constant 0 : i32
    %0 = arith.cmpi eq, %arg1, %c0_i32 : i32
    %1 = arith.extui %0 : i1 to i32
    %c0_i32_0 = arith.constant 0 : i32
    %2 = arith.cmpi ne, %1, %c0_i32_0 : i32
    scf.if %2 {
      %cst_54 = arith.constant 0.000000e+00 : f32
      %126 = vector.broadcast %cst_54 : f32 to vector<1x3x8x128xf32>
      %c0_55 = arith.constant 0 : index
      %c0_56 = arith.constant 0 : index
      %c0_57 = arith.constant 0 : index
      %c0_58 = arith.constant 0 : index
      %127 = vector.load %arg4[%c0_55, %c0_56, %c0_57, %c0_58] : memref<1x3x8x128xf32, #tpu.memory_space<vmem>>, vector<1x3x8x128xf32>
      tpu.vector_store %arg4[%c0_55, %c0_56, %c0_57, %c0_58], %126 {strides = array<i32>} : memref<1x3x8x128xf32, #tpu.memory_space<vmem>>, vector<1x3x8x128xf32>,
    } else {
    }
    %cst = arith.constant 0.000000e+00 : f32
    %3 = vector.broadcast %cst : f32 to vector<8x128xf32>
    %cst_1 = arith.constant 0.000000e+00 : f32
    %4 = vector.broadcast %cst_1 : f32 to vector<8x128xf32>
    %cst_2 = arith.constant 0.000000e+00 : f32
    %5 = vector.broadcast %cst_2 : f32 to vector<8x128xf32>
    %c0_i32_3 = arith.constant 0 : i32
    %c8_i32 = arith.constant 8 : i32
    %6 = arith.muli %c0_i32_3, %c8_i32 : i32
    %7 = tpu.assume_multiple %6, 8 : i32
    %8 = arith.index_cast %7 : i32 to index
    %c0 = arith.constant 0 : index
    %9 = vector.load %arg3[%8, %c0] : memref<8x128xi32, #tpu.memory_space<vmem>>, vector<8x128xi32>
    %c0_i32_4 = arith.constant 0 : i32
    %10 = vector.broadcast %c0_i32_4 : i32 to vector<8x128xi32>
    %11 = arith.cmpi ne, %9, %10 : vector<8x128xi32>
    %12 = arith.extui %11 : vector<8x128xi1> to vector<8x128xi32>
    %13 = arith.sitofp %12 : vector<8x128xi32> to vector<8x128xf32>
    %c0_5 = arith.constant 0 : index
    %14 = arith.index_cast %7 : i32 to index
    %c0_6 = arith.constant 0 : index
    %15 = vector.load %arg2[%c0_5, %14, %c0_6] : memref<4x8x128xf32, #tpu.memory_space<vmem>>, vector<1x8x128xf32>
    %16 = vector.shape_cast %15 : vector<1x8x128xf32> to vector<8x128xf32>
    %c1 = arith.constant 1 : index
    %17 = arith.index_cast %7 : i32 to index
    %c0_7 = arith.constant 0 : index
    %18 = vector.load %arg2[%c1, %17, %c0_7] : memref<4x8x128xf32, #tpu.memory_space<vmem>>, vector<1x8x128xf32>
    %19 = vector.shape_cast %18 : vector<1x8x128xf32> to vector<8x128xf32>
    %20 = arith.maximumf %16, %19 : vector<8x128xf32>
    %c2 = arith.constant 2 : index
    %21 = arith.index_cast %7 : i32 to index
    %c0_8 = arith.constant 0 : index
    %22 = vector.load %arg2[%c2, %21, %c0_8] : memref<4x8x128xf32, #tpu.memory_space<vmem>>, vector<1x8x128xf32>
    %23 = vector.shape_cast %22 : vector<1x8x128xf32> to vector<8x128xf32>
    %24 = arith.maximumf %20, %23 : vector<8x128xf32>
    %c3 = arith.constant 3 : index
    %25 = arith.index_cast %7 : i32 to index
    %c0_9 = arith.constant 0 : index
    %26 = vector.load %arg2[%c3, %25, %c0_9] : memref<4x8x128xf32, #tpu.memory_space<vmem>>, vector<1x8x128xf32>
    %27 = vector.shape_cast %26 : vector<1x8x128xf32> to vector<8x128xf32>
    %28 = arith.maximumf %24, %27 : vector<8x128xf32>
    %cst_10 = arith.constant 0.000000e+00 : f32
    %29 = vector.broadcast %cst_10 : f32 to vector<8x128xf32>
    %cst_11 = arith.constant 0.000000e+00 : f32
    %30 = vector.broadcast %cst_11 : f32 to vector<8x128xf32>
    %false = arith.constant false
    %31 = vector.broadcast %false : i1 to vector<8x128xi1>
    %false_12 = arith.constant false
    %32 = vector.broadcast %false_12 : i1 to vector<8x128xi1>
    %c0_13 = arith.constant 0 : index
    %33 = arith.index_cast %7 : i32 to index
    %c0_14 = arith.constant 0 : index
    %34 = vector.load %arg2[%c0_13, %33, %c0_14] : memref<4x8x128xf32, #tpu.memory_space<vmem>>, vector<1x8x128xf32>
    %35 = vector.shape_cast %34 : vector<1x8x128xf32> to vector<8x128xf32>
    %36 = arith.subf %35, %28 : vector<8x128xf32>
    %37 = math.exp %36 : vector<8x128xf32>
    %38 = arith.addf %29, %37 : vector<8x128xf32>
    %c0_i32_15 = arith.constant 0 : i32
    %39 = vector.broadcast %c0_i32_15 : i32 to vector<8x128xi32>
    %40 = arith.cmpi eq, %9, %39 : vector<8x128xi32>
    %41 = arith.select %40, %35, %30 : vector<8x128xi1>, vector<8x128xf32>
    %42 = arith.cmpf oeq, %35, %28 : vector<8x128xf32>
    %43 = arith.andi %40, %42 : vector<8x128xi1>
    %cst_16 = arith.constant dense<true> : vector<8x128xi1>
    %44 = arith.xori %32, %cst_16 : vector<8x128xi1>
    %45 = arith.andi %43, %44 : vector<8x128xi1>
    %46 = arith.ori %31, %45 : vector<8x128xi1>
    %47 = arith.ori %32, %42 : vector<8x128xi1>
    %c1_17 = arith.constant 1 : index
    %48 = arith.index_cast %7 : i32 to index
    %c0_18 = arith.constant 0 : index
    %49 = vector.load %arg2[%c1_17, %48, %c0_18] : memref<4x8x128xf32, #tpu.memory_space<vmem>>, vector<1x8x128xf32>
    %50 = vector.shape_cast %49 : vector<1x8x128xf32> to vector<8x128xf32>
    %51 = arith.subf %50, %28 : vector<8x128xf32>
    %52 = math.exp %51 : vector<8x128xf32>
    %53 = arith.addf %38, %52 : vector<8x128xf32>
    %c1_i32 = arith.constant 1 : i32
    %54 = vector.broadcast %c1_i32 : i32 to vector<8x128xi32>
    %55 = arith.cmpi eq, %9, %54 : vector<8x128xi32>
    %56 = arith.select %55, %50, %41 : vector<8x128xi1>, vector<8x128xf32>
    %57 = arith.cmpf oeq, %50, %28 : vector<8x128xf32>
    %58 = arith.andi %55, %57 : vector<8x128xi1>
    %cst_19 = arith.constant dense<true> : vector<8x128xi1>
    %59 = arith.xori %47, %cst_19 : vector<8x128xi1>
    %60 = arith.andi %58, %59 : vector<8x128xi1>
    %61 = arith.ori %46, %60 : vector<8x128xi1>
    %62 = arith.ori %47, %57 : vector<8x128xi1>
    %c2_20 = arith.constant 2 : index
    %63 = arith.index_cast %7 : i32 to index
    %c0_21 = arith.constant 0 : index
    %64 = vector.load %arg2[%c2_20, %63, %c0_21] : memref<4x8x128xf32, #tpu.memory_space<vmem>>, vector<1x8x128xf32>
    %65 = vector.shape_cast %64 : vector<1x8x128xf32> to vector<8x128xf32>
    %66 = arith.subf %65, %28 : vector<8x128xf32>
    %67 = math.exp %66 : vector<8x128xf32>
    %68 = arith.addf %53, %67 : vector<8x128xf32>
    %c2_i32 = arith.constant 2 : i32
    %69 = vector.broadcast %c2_i32 : i32 to vector<8x128xi32>
    %70 = arith.cmpi eq, %9, %69 : vector<8x128xi32>
    %71 = arith.select %70, %65, %56 : vector<8x128xi1>, vector<8x128xf32>
    %72 = arith.cmpf oeq, %65, %28 : vector<8x128xf32>
    %73 = arith.andi %70, %72 : vector<8x128xi1>
    %cst_22 = arith.constant dense<true> : vector<8x128xi1>
    %74 = arith.xori %62, %cst_22 : vector<8x128xi1>
    %75 = arith.andi %73, %74 : vector<8x128xi1>
    %76 = arith.ori %61, %75 : vector<8x128xi1>
    %77 = arith.ori %62, %72 : vector<8x128xi1>
    %c3_23 = arith.constant 3 : index
    %78 = arith.index_cast %7 : i32 to index
    %c0_24 = arith.constant 0 : index
    %79 = vector.load %arg2[%c3_23, %78, %c0_24] : memref<4x8x128xf32, #tpu.memory_space<vmem>>, vector<1x8x128xf32>
    %80 = vector.shape_cast %79 : vector<1x8x128xf32> to vector<8x128xf32>
    %81 = arith.subf %80, %28 : vector<8x128xf32>
    %82 = math.exp %81 : vector<8x128xf32>
    %83 = arith.addf %68, %82 : vector<8x128xf32>
    %c3_i32 = arith.constant 3 : i32
    %84 = vector.broadcast %c3_i32 : i32 to vector<8x128xi32>
    %85 = arith.cmpi eq, %9, %84 : vector<8x128xi32>
    %86 = arith.select %85, %80, %71 : vector<8x128xi1>, vector<8x128xf32>
    %87 = arith.cmpf oeq, %80, %28 : vector<8x128xf32>
    %88 = arith.andi %85, %87 : vector<8x128xi1>
    %cst_25 = arith.constant dense<true> : vector<8x128xi1>
    %89 = arith.xori %77, %cst_25 : vector<8x128xi1>
    %90 = arith.andi %88, %89 : vector<8x128xi1>
    %91 = arith.ori %76, %90 : vector<8x128xi1>
    %92 = math.log %83 : vector<8x128xf32>
    %93 = arith.addf %28, %92 : vector<8x128xf32>
    %94 = arith.subf %93, %86 : vector<8x128xf32>
    %95 = arith.mulf %94, %13 : vector<8x128xf32>
    %96 = arith.extui %91 : vector<8x128xi1> to vector<8x128xi32>
    %97 = arith.sitofp %96 : vector<8x128xi32> to vector<8x128xf32>
    %98 = arith.mulf %13, %97 : vector<8x128xf32>
    %99 = vector.shape_cast %95 : vector<8x128xf32> to vector<1x8x128xf32>
    %cst_26 = arith.constant dense<0.000000e+00> : vector<8x128xf32>
    %100 = vector.multi_reduction <add>, %99, %cst_26 [0] : vector<1x8x128xf32> to vector<8x128xf32>
    %101 = arith.addf %3, %100 : vector<8x128xf32>
    %102 = vector.shape_cast %13 : vector<8x128xf32> to vector<1x8x128xf32>
    %cst_27 = arith.constant dense<0.000000e+00> : vector<8x128xf32>
    %103 = vector.multi_reduction <add>, %102, %cst_27 [0] : vector<1x8x128xf32> to vector<8x128xf32>
    %104 = arith.addf %4, %103 : vector<8x128xf32>
    %105 = vector.shape_cast %98 : vector<8x128xf32> to vector<1x8x128xf32>
    %cst_28 = arith.constant dense<0.000000e+00> : vector<8x128xf32>
    %106 = vector.multi_reduction <add>, %105, %cst_28 [0] : vector<1x8x128xf32> to vector<8x128xf32>
    %107 = arith.addf %5, %106 : vector<8x128xf32>
    %c1_i32_29 = arith.constant 1 : i32
    %c0_30 = arith.constant 0 : index
    %c0_31 = arith.constant 0 : index
    %c0_32 = arith.constant 0 : index
    %c0_33 = arith.constant 0 : index
    %108 = vector.load %arg4[%c0_30, %c0_31, %c0_32, %c0_33] : memref<1x3x8x128xf32, #tpu.memory_space<vmem>>, vector<1x1x8x128xf32>
    %109 = vector.shape_cast %108 : vector<1x1x8x128xf32> to vector<8x128xf32>
    %110 = arith.addf %109, %101 : vector<8x128xf32>
    %c0_34 = arith.constant 0 : index
    %c0_35 = arith.constant 0 : index
    %c0_36 = arith.constant 0 : index
    %c0_37 = arith.constant 0 : index
    %111 = vector.load %arg4[%c0_34, %c0_35, %c0_36, %c0_37] : memref<1x3x8x128xf32, #tpu.memory_space<vmem>>, vector<1x1x8x128xf32>
    %112 = vector.shape_cast %111 : vector<1x1x8x128xf32> to vector<8x128xf32>
    %113 = vector.shape_cast %110 : vector<8x128xf32> to vector<1x1x8x128xf32>
    tpu.vector_store %arg4[%c0_34, %c0_35, %c0_36, %c0_37], %113 {strides = array<i32>} : memref<1x3x8x128xf32, #tpu.memory_space<vmem>>, vector<1x1x8x128xf32>,
    %c0_38 = arith.constant 0 : index
    %c1_39 = arith.constant 1 : index
    %c0_40 = arith.constant 0 : index
    %c0_41 = arith.constant 0 : index
    %114 = vector.load %arg4[%c0_38, %c1_39, %c0_40, %c0_41] : memref<1x3x8x128xf32, #tpu.memory_space<vmem>>, vector<1x1x8x128xf32>
    %115 = vector.shape_cast %114 : vector<1x1x8x128xf32> to vector<8x128xf32>
    %116 = arith.addf %115, %104 : vector<8x128xf32>
    %c0_42 = arith.constant 0 : index
    %c1_43 = arith.constant 1 : index
    %c0_44 = arith.constant 0 : index
    %c0_45 = arith.constant 0 : index
    %117 = vector.load %arg4[%c0_42, %c1_43, %c0_44, %c0_45] : memref<1x3x8x128xf32, #tpu.memory_space<vmem>>, vector<1x1x8x128xf32>
    %118 = vector.shape_cast %117 : vector<1x1x8x128xf32> to vector<8x128xf32>
    %119 = vector.shape_cast %116 : vector<8x128xf32> to vector<1x1x8x128xf32>
    tpu.vector_store %arg4[%c0_42, %c1_43, %c0_44, %c0_45], %119 {strides = array<i32>} : memref<1x3x8x128xf32, #tpu.memory_space<vmem>>, vector<1x1x8x128xf32>,
    %c0_46 = arith.constant 0 : index
    %c2_47 = arith.constant 2 : index
    %c0_48 = arith.constant 0 : index
    %c0_49 = arith.constant 0 : index
    %120 = vector.load %arg4[%c0_46, %c2_47, %c0_48, %c0_49] : memref<1x3x8x128xf32, #tpu.memory_space<vmem>>, vector<1x1x8x128xf32>
    %121 = vector.shape_cast %120 : vector<1x1x8x128xf32> to vector<8x128xf32>
    %122 = arith.addf %121, %107 : vector<8x128xf32>
    %c0_50 = arith.constant 0 : index
    %c2_51 = arith.constant 2 : index
    %c0_52 = arith.constant 0 : index
    %c0_53 = arith.constant 0 : index
    %123 = vector.load %arg4[%c0_50, %c2_51, %c0_52, %c0_53] : memref<1x3x8x128xf32, #tpu.memory_space<vmem>>, vector<1x1x8x128xf32>
    %124 = vector.shape_cast %123 : vector<1x1x8x128xf32> to vector<8x128xf32>
    %125 = vector.shape_cast %122 : vector<8x128xf32> to vector<1x1x8x128xf32>
    tpu.vector_store %arg4[%c0_50, %c2_51, %c0_52, %c0_53], %125 {strides = array<i32>} : memref<1x3x8x128xf32, #tpu.memory_space<vmem>>, vector<1x1x8x128xf32>,
    return
  }
  func.func @transform_0(%arg0: i32, %arg1: i32) -> (i32, i32, i32) {
    %c1_i32 = arith.constant 1 : i32
    %0 = arith.muli %arg0, %c1_i32 : i32
    %1 = arith.addi %0, %arg1 : i32
    %c0_i32 = arith.constant 0 : i32
    %c0_i32_0 = arith.constant 0 : i32
    %c0_i32_1 = arith.constant 0 : i32
    return %c0_i32, %1, %c0_i32_0 : i32, i32, i32
  }
  func.func @transform_1(%arg0: i32, %arg1: i32) -> (i32, i32) {
    %c1_i32 = arith.constant 1 : i32
    %0 = arith.muli %arg0, %c1_i32 : i32
    %1 = arith.addi %0, %arg1 : i32
    %c0_i32 = arith.constant 0 : i32
    %c0_i32_0 = arith.constant 0 : i32
    return %1, %c0_i32 : i32, i32
  }
  func.func @transform_2(%arg0: i32, %arg1: i32) -> (i32, i32, i32, i32) {
    %c0_i32 = arith.constant 0 : i32
    %c0_i32_0 = arith.constant 0 : i32
    %c0_i32_1 = arith.constant 0 : i32
    %c0_i32_2 = arith.constant 0 : i32
    return %arg0, %c0_i32, %c0_i32_0, %c0_i32_1 : i32, i32, i32, i32
  }
}

</mosaic_0001>

<bundles_post_ra>
// kernel: _ce_and_acc.1
= control target key start
LH: loop header
LB: loop body
LE: loop exit
PB: predicated region body
PF: predicated region fallthrough
CT: control target
= control target key end

     0   :  { %s539_s9 = smov 0   ;;  %s541_s10 = smov 0   ;;  %s644_s0 = inlined_call_operand.vmem [shape: f32[4,16,128], index: 0, kind: input, shape index: {}]   ;;  %s645_s1 = inlined_call_operand.vmem [shape: s32[16,128], index: 1, kind: input, shape index: {}]   ;;  %s646_s2 = inlined_call_operand.vmem [shape: f32[2,3,8,128], index: 2, kind: output, shape index: {}]  }
   0x1   :  { %s543_s11 = smov 0   ;;  %s545_s12 = smov 0  }
   0x2   :  { %s547_s13 = smov 0  }
   0x3 LB: > { %s24_s14 = sadd.s32 1, %s516_s12  ;;  %p40_p1 = scmp.ne.s32.totalorder %s508_s10, %s504_s9  ;;  %s520_s13 = sphi %s547_s13, %s12_s13   ;;  %s516_s12 = sphi %s545_s12, %s654_s12   ;;  %s512_s11 = sphi %s543_s11, %s653_s11   ;;  %s508_s10 = sphi %s541_s10, %s652_s10   ;;  %s504_s9 = sphi %s539_s9, %s651_s9  }
   0x4   : > { %p26_p0 = scmp.ge.s32.totalorder %s24_s14, 2  ;;  %p41_p2 = scmp.eq.s32.totalorder %s520_s13, 0 }
   0x5   : > { %s33_s16 = sadd.s32 1, %s508_s10  ;;  %p411_p5 = scmp.ge.s32.totalorder %s520_s13, 2 }
   0x6   : > { %s656_s14 = smov (%p26_p0, %s24_s14), 0  ;;  %p42_p3 = por %p41_p2, %p40_p1 }
   0x7   : > { %s30_s15 = ssub.s32 %s516_s12, %s656_s14  ;;  %120 = sbr.rel (%p411_p5) target bundleno = 18 (0x12), region = 16 }
   0x8   : > { %p31_p4 = scmp.eq.s32.totalorder %s30_s15, 0 }
   0xa   : > { %s574_s17 = scalar_select %p31_p4, %s508_s10, %s33_s16  }
   0xc   : > { %123 = sbr.rel (!%p42_p3) target bundleno = 18 (0x12), region = 20  ;;  %s125_s18 = sand.u32 (%p42_p3), 1, %s508_s10  }
   0xd   : > { %s413_s19 = sshll.u32 (%p42_p3), %s516_s12, 3  ;;  %s412_s20 = sshll.u32 (%p42_p3), %s125_s18, 5 }
   0xe   : > { %s130_s23 = scalar_lea.vmem (%p42_p3), %s644_s0, %s413_s19  ;;  %s127_s24 = scalar_lea.vmem (%p42_p3), [#allocation2], %s412_s20 }
   0xf   : > { %v165_v0 = vld [vmem:[%s130_s23] sm:$0xff] (%p42_p3)  ;;  %v167_v1 = vld [vmem:[%s130_s23 + $0x10] sm:$0xff] (%p42_p3) }
  0x10   : > { %v169_v2 = vld [vmem:[%s130_s23 + $0x20] sm:$0xff] (%p42_p3)  ;;  %166 = vst [vmem:[%s127_s24] sm:$0xff] (%p42_p3), %v165_v0  ;;  %168 = vst [vmem:[%s127_s24 + $0x8] sm:$0xff] (%p42_p3), %v167_v1  ;;  %v171_v3 = vld [vmem:[%s130_s23 + $0x30] sm:$0xff] (%p42_p3) }
  0x11   : > { %170 = vst [vmem:[%s127_s24 + $0x10] sm:$0xff] %v169_v2  ;;  %172 = vst [vmem:[%s127_s24 + $0x18] sm:$0xff] %v171_v3 }
  0x12 PF: > { %p414_p6 = scmp.ge.s32.totalorder %s520_s13, 1  ;;  %p186_p7 = scmp.lt.s32.totalorder %s520_s13, 3 }
  0x14   : > { %p187_p8 = pnand %p414_p6, %p186_p7 }
  0x15   : > { %p221_p9 = scmp.lt.s32.totalorder (!%p187_p8), %s512_s11, 1  ;;  %s193_s25 = sand.u32 (!%p187_p8), 1, %s504_s9  }
  0x16   : > { %190 = sbr.rel (%p187_p8) target bundleno = 82 (0x52), region = 62  ;;  %s415_s26 = sshll.u32 (!%p187_p8), %s193_s25, 5 }
  0x17   : > { %s195_s29 = scalar_lea.vmem (!%p187_p8), [#allocation2], %s415_s26 }
  0x1b   : > { %s658_s11 = smov (!%p221_p9, %s512_s11), 1  ;;  %v242_v4 = vld [vmem:[%s195_s29] sm:$0xff]  ;;  %v419_v5 = vld [vmem:[%s195_s29 + $0x8] sm:$0xff]  ;;  %v420_v6 = vld [vmem:[%s195_s29 + $0x10] sm:$0xff]  ;;  %v522_v11 = vmov 0.0   ;;  %vm523_vm7 = vmmov 1  }
  0x1c   : > { %s429_s27 = smul.u32 24, %s658_s11  ;;  %s416_s28 = sshll.u32 %s658_s11, 3  ;;  %v246_v7 = vmax.f32 %v242_v4, %v419_v5  ;;  %v421_v9 = vld [vmem:[%s195_s29 + $0x18] sm:$0xff] }
  0x1d   : > { %s224_s4 = scalar_lea.vmem %s645_s1, %s416_s28 }
  0x1e   : > { %v590_v8 = vld [vmem:[%s224_s4] sm:$0xff]  ;;  %v250_v10 = vmax.f32 %v246_v7, %v420_v6  ;;  %s596_s7 = scalar_lea.vmem %s646_s2, %s429_s27 }
  0x1f   : > { %vm239_vm0 = vcmp.ne.s32.totalorder %v590_v8, 0  ;;  %vm648_vm1 = vcmp.eq.s32.totalorder %v590_v8, 0  ;;  %vm647_vm2 = vcmp.eq.s32.totalorder %v590_v8, 1  ;;  %vm279_vm9 = vcmp.eq.s32.totalorder %v590_v8, 2 }
  0x20   : > { %v418_v12 = vsel %vm239_vm0, 1.0, %v522_v11  ;;  %v254_v13 = vmax.f32 %v250_v10, %v421_v9  ;;  %vm291_vm0 = vcmp.eq.s32.totalorder %v590_v8, 3 }
  0x21   : > { %424 = vst [vmem:[%s596_s7 + $0x8] sm:$0xff] %v418_v12 }
  0x22   : > { %v255_v14 = vsub.f32 %v242_v4, %v254_v13  ;;  %v263_v15 = vsub.f32 %v419_v5, %v254_v13  ;;  %v275_v16 = vsub.f32 %v420_v6, %v254_v13  ;;  %v287_v17 = vsub.f32 %v421_v9, %v254_v13 }
  0x23   : > { %vm261_vm3 = vcmp.eq.f32.partialorder %v242_v4, %v254_v13  ;;  %vm269_vm4 = vcmp.eq.f32.partialorder %v419_v5, %v254_v13  ;;  %vm281_vm11 = vcmp.eq.f32.partialorder %v420_v6, %v254_v13 }
  0x24   : > { %v256_v18 = vmul.f32 1.442695, %v255_v14  ;;  %v264_v19 = vmul.f32 1.442695, %v263_v15  ;;  %v276_v20 = vmul.f32 1.442695, %v275_v16  ;;  %vm262_vm5 = vmand %vm648_vm1, %vm261_vm3  ;;  %vm293_vm1 = vcmp.eq.f32.partialorder %v421_v9, %v254_v13 }
  0x25   : > { %v288_v21 = vmul.f32 1.442695, %v287_v17  ;;  %vm270_vm6 = vmand %vm647_vm2, %vm269_vm4 }
  0x26   : > { %472 = vpow2.f32 %v256_v18  ;;  %vm271_vm8 = vmxor %vm261_vm3, %vm523_vm7 }
  0x27   : > { %474 = vpow2.f32 %v264_v19  ;;  %vm272_vm10 = vmand %vm270_vm6, %vm271_vm8 }
  0x28   : > { %476 = vpow2.f32 %v276_v20  ;;  %vm273_vm12 = vmor %vm262_vm5, %vm272_vm10 }
  0x29   : > { %478 = vpow2.f32 %v288_v21  ;;  %vm274_vm13 = vmor %vm261_vm3, %vm269_vm4 }
  0x2a   : > { %vm282_vm14 = vmand %vm279_vm9, %vm281_vm11 }
  0x2b   : > { %vm283_vm15 = vmxor %vm274_vm13, %vm523_vm7 }
  0x2c   : > { %vm284_vm2 = vmand %vm282_vm14, %vm283_vm15 }
  0x2d   : > { %vm285_vm6 = vmor %vm273_vm12, %vm284_vm2  ;;  %vm649_vm2 = vcmp.eq.s32.totalorder %v590_v8, 0 }
  0x2e   : > { %vm286_vm8 = vmor %vm274_vm13, %vm281_vm11  ;;  %v260_v31 = vsel %vm649_vm2, %v242_v4, 0.0 }
  0x2f   : > { %vm294_vm5 = vmand %vm291_vm0, %vm293_vm1  ;;  %vm650_vm1 = vcmp.eq.s32.totalorder %v590_v8, 1 }
  0x30   : > { %vm295_vm10 = vmxor %vm286_vm8, %vm523_vm7  ;;  %v268_v32 = vsel %vm650_vm1, %v419_v5, %v260_v31 }
  0x31   : > { %vm296_vm3 = vmand %vm294_vm5, %vm295_vm10  ;;  %v280_v33 = vsel %vm279_vm9, %v420_v6, %v268_v32 }
  0x32   : > { %vm297_vm4 = vmor %vm285_vm6, %vm296_vm3  ;;  %v292_v36 = vsel %vm291_vm0, %v421_v9, %v280_v33 }
  0x33   : > { %v473_v22 = vpop.eup %472  ;;  %v422_v23 = vsel %vm297_vm4, 1.0, %v522_v11 }
  0x34   : > { %v475_v24 = vpop.eup %474  ;;  %v305_v25 = vmul.f32 %v422_v23, %v418_v12 }
  0x35   : > { %v477_v26 = vpop.eup %476  ;;  %v266_v27 = vadd.f32 %v475_v24, %v473_v22 }
  0x36   : > { %v479_v28 = vpop.eup %478  ;;  %426 = vst [vmem:[%s596_s7 + $0x10] sm:$0xff] %v305_v25 }
  0x37   : > { %v278_v29 = vadd.f32 %v477_v26, %v266_v27 }
  0x39   : > { %v290_v30 = vadd.f32 %v479_v28, %v278_v29 }
  0x3b   : > { %480 = vlog2.f32 %v290_v30 }
  0x48   : > { %v481_v34 = vpop.eup %480 }
  0x49   : > { %v299_v35 = vmul.f32 0.6931472, %v481_v34 }
  0x4b   : > { %v300_v37 = vadd.f32 %v299_v35, %v254_v13 }
  0x4d   : > { %v301_v38 = vsub.f32 %v300_v37, %v292_v36 }
  0x4f   : > { %v302_v39 = vmul.f32 %v418_v12, %v301_v38 }
  0x51   : > { %314 = vst [vmem:[%s596_s7] sm:$0xff] %v302_v39 }
  0x52 PF: > { %s12_s13 = sadd.s32 1, %s520_s13   ;;  %s651_s9 = smov %s508_s10 }
  0x53   : > { %p9_p10 = scmp.ge.s32.totalorder %s12_s13, 4   ;;  %s652_s10 = smov %s574_s17 }
  0x54   : > { %s653_s11 = smov %s516_s12  ;;  %s654_s12 = smov %s656_s14 }
  0x55   :  { %11 = sbr.rel (!%p9_p10) target bundleno = 3 (0x3), region = 113 }

</bundles_post_ra>
